<compile_context>
chip_gen: v6e
topology: v6e:2x2x1
jax: 0.10.0
libtpu: 0.0.40
codegen_flags: <defaults>
</compile_context>

<pallas_src>
import jax
import jax.numpy as jnp
from jax import lax
from jax.experimental import pallas as pl
from jax.experimental.pallas import tpu as pltpu


def _dwconv_kernel(xc_ref, xt_ref, xb_ref, w_ref, b_ref, o_ref, vbuf):
    # xc_ref : (1, th, W, tc)  row/channel tile of the (unpadded) input
    # xt_ref : (1, 1,  W, tc)  row just above the tile (clamped at the border)
    # xb_ref : (1, 1,  W, tc)  row just below the tile (clamped at the border)
    # w_ref  : (3, 3, tc)      depthwise taps
    # b_ref  : (1, tc)         bias
    # o_ref  : (1, th, W, tc)  output tile
    # vbuf   : (th+2, W, tc)   f32 scratch holding the vertically padded tile
    th, W = o_ref.shape[1], o_ref.shape[2]
    f32 = jnp.float32

    r = pl.program_id(2)
    nr = pl.num_programs(2)
    top_valid = (r > 0).astype(f32)            # padding=1 at the image top
    bot_valid = (r < nr - 1).astype(f32)       # padding=1 at the image bottom

    # ---- one aligned copy into the vertically padded scratch ---------------
    x_mid = xc_ref[0].astype(f32)                          # (th, W, tc)
    vbuf[1:th + 1] = x_mid
    vbuf[0:1] = xt_ref[0].astype(f32) * top_valid          # (1, W, tc)
    vbuf[th + 1:th + 2] = xb_ref[0].astype(f32) * bot_valid

    w = w_ref[...].astype(f32)                             # (3, 3, tc), hoisted
    bias = b_ref[0].astype(f32)                            # (tc,)

    # Windows over the padded rows (aligned outer-dim slices; win1 reuses the
    # value already loaded for the fill).
    win0 = vbuf[0:th]                                      # rows h-1
    win1 = x_mid                                           # rows h
    win2 = vbuf[2:th + 2]                                  # rows h+1

    # Per-kernel-column partial sums, then ONE XLU roll per horizontal shift.
    s_l = win0 * w[0, 0] + win1 * w[1, 0] + win2 * w[2, 0]
    s_c = win0 * w[0, 1] + win1 * w[1, 1] + win2 * w[2, 1]
    s_r = win0 * w[0, 2] + win1 * w[1, 2] + win2 * w[2, 2]

    left = pltpu.roll(s_l, 1, axis=1)                      # left[w]  = s_l[w-1]
    right = pltpu.roll(s_r, W - 1, axis=1)                 # right[w] = s_r[w+1]
    col = lax.broadcasted_iota(jnp.int32, s_l.shape, 1)
    left = jnp.where(col == 0, 0.0, left)                  # zero pad at w == 0
    right = jnp.where(col == W - 1, 0.0, right)            # zero pad at w == W-1

    o_ref[0] = (s_c + bias + left + right).astype(o_ref.dtype)


def dwconv_pallas(x, weight, bias, H, W, *, th=None, tc=None):
    """Depthwise 3x3 conv (stride 1, pad 1) + bias.

    x: (B, N, C) with N == H*W; weight: (3, 3, C); bias: (C,). Returns (B, N, C).
    """
    B, N, C = x.shape
    assert N == H * W
    itemsize = jnp.dtype(x.dtype).itemsize

    # ---- channel tile: keep the lane axis 128-dense whenever possible ------
    if tc is None:
        if C % 128 == 0:
            tc = 128
            while tc * 2 <= min(C, 512) and C % (tc * 2) == 0:
                tc *= 2
        else:
            # TODO(synk): small-C fallback stores with <128-wide lanes (masked
            # vst); fold W into the lane axis if this path ever matters.
            tc = C
    assert C % tc == 0, "tc must divide C"

    # ---- per-chip VMEM budget (64 MiB/TC on v7x, 128 MiB on v5e/v6e) -------
    try:
        vmem_cap = int(pltpu.get_tpu_info().vmem_capacity_bytes)
    except Exception:
        vmem_cap = 128 << 20
    scoped_cap = max(16 << 20, min(vmem_cap // 2, 64 << 20))
    block_budget = scoped_cap // 2

    def footprint(th_):
        in_blk = th_ * W * tc * itemsize
        halo = 2 * W * tc * itemsize
        out_blk = th_ * W * tc * itemsize
        wb = 10 * tc * itemsize
        dma = 2 * (in_blk + halo + out_blk + wb)    # double-buffered pipeline
        scratch = (th_ + 2) * W * tc * 4            # f32 vertical-halo scratch
        temps = 6 * th_ * W * tc * 4                # f32 value temporaries
        return dma + scratch + temps

    # ---- row tile: largest divisor of H fitting the budget (no 1 MiB cliff) --
    if th is None:
        divs = [d for d in range(1, H + 1) if H % d == 0]
        fits = [d for d in divs if footprint(d) <= block_budget]
        th = max(fits) if fits else 1
    assert H % th == 0, "th must divide H"

    # ---- keep the grid >= 2 steps so both v7x TensorCores get work ---------
    if B * (C // tc) * (H // th) < 2:
        if tc >= 256:
            tc //= 2
        elif th % 2 == 0:
            th //= 2

    vmem_limit = int(min(vmem_cap * 7 // 8,
                         max(scoped_cap, footprint(th) * 5 // 4)))

    x_img = x.reshape(B, H, W, C)
    bias2d = bias.reshape(1, C)
    grid = (B, C // tc, H // th)     # row axis fastest -> taps/bias stay resident

    center_spec = pl.BlockSpec((1, th, W, tc), lambda b, c, r: (b, r, 0, c))
    # Halo row blocks MUST keep a row block size of 1 (block index == row index).
    top_spec = pl.BlockSpec(
        (1, 1, W, tc), lambda b, c, r: (b, jnp.maximum(r * th - 1, 0), 0, c))
    bot_spec = pl.BlockSpec(
        (1, 1, W, tc), lambda b, c, r: (b, jnp.minimum(r * th + th, H - 1), 0, c))
    w_spec = pl.BlockSpec((3, 3, tc), lambda b, c, r: (0, 0, c))
    b_spec = pl.BlockSpec((1, tc), lambda b, c, r: (0, c))
    out_spec = pl.BlockSpec((1, th, W, tc), lambda b, c, r: (b, r, 0, c))

    out = pl.pallas_call(
        _dwconv_kernel,
        out_shape=jax.ShapeDtypeStruct((B, H, W, C), x.dtype),
        grid_spec=pltpu.PrefetchScalarGridSpec(
            num_scalar_prefetch=0,
            grid=grid,
            in_specs=[center_spec, top_spec, bot_spec, w_spec, b_spec],
            out_specs=out_spec,
            scratch_shapes=[pltpu.VMEM((th + 2, W, tc), jnp.float32)],
        ),
        compiler_params=pltpu.CompilerParams(
            dimension_semantics=("parallel", "parallel", "parallel"),
            vmem_limit_bytes=vmem_limit,
        ),
    )(x_img, x_img, x_img, weight, bias2d)

    return out.reshape(B, N, C)


def dwconv_reference(x, weight, bias, H, W):
    """Pure-JAX reference mirroring PyTorch semantics (NCHW depthwise conv)."""
    B, N, C = x.shape
    x_nchw = jnp.transpose(x, (0, 2, 1)).reshape(B, C, H, W)
    w_oihw = jnp.transpose(weight, (2, 0, 1))[:, None, :, :]   # (C,1,3,3)
    y = lax.conv_general_dilated(
        x_nchw, w_oihw, window_strides=(1, 1), padding=((1, 1), (1, 1)),
        dimension_numbers=("NCHW", "OIHW", "NCHW"), feature_group_count=C,
        precision=lax.Precision.HIGHEST)
    y = y + bias[None, :, None, None]
    return jnp.transpose(y.reshape(B, C, H * W), (0, 2, 1))


if __name__ == "__main__":
    key = jax.random.PRNGKey(0)
    kx, kw, kb = jax.random.split(key, 3)

    # Case 1: lane-dense channels, explicit row+channel tiling -> exercises the
    # vertical-halo masking and rolled width shifts across many grid steps.
    B, C, H, W = 2, 256, 16, 16
    N = H * W
    x = jax.random.normal(kx, (B, N, C), dtype=jnp.float32)
    weight = jax.random.normal(kw, (3, 3, C), dtype=jnp.float32) * 0.1
    bias = jax.random.normal(kb, (C,), dtype=jnp.float32) * 0.1

    out = jax.block_until_ready(dwconv_pallas(x, weight, bias, H, W, th=4, tc=128))
    ref = dwconv_reference(x, weight, bias, H, W)
    assert out.shape == (B, N, C)
    assert jnp.allclose(out, ref, atol=1e-4, rtol=1e-4), "mismatch (C=256, tiled)"

    # Case 2: auto tiling (full-height tile) -> both halo rows masked to zero.
    out_a = jax.block_until_ready(dwconv_pallas(x, weight, bias, H, W))
    assert jnp.allclose(out_a, ref, atol=1e-4, rtol=1e-4), "mismatch (C=256, auto)"

    # Case 3: small C (not a multiple of 128) -> full-channel fallback block.
    C2 = 4
    x2 = jax.random.normal(kx, (B, N, C2), dtype=jnp.float32)
    w2 = jax.random.normal(kw, (3, 3, C2), dtype=jnp.float32) * 0.1
    b2 = jax.random.normal(kb, (C2,), dtype=jnp.float32) * 0.1
    out2 = jax.block_until_ready(dwconv_pallas(x2, w2, b2, H, W))
    ref2 = dwconv_reference(x2, w2, b2, H, W)
    assert jnp.allclose(out2, ref2, atol=1e-4, rtol=1e-4), "mismatch (C=4)"

    # Case 4: bf16 activations through HBM, f32 accumulation inside the kernel.
    x3 = x.astype(jnp.bfloat16)
    out3 = jax.block_until_ready(dwconv_pallas(x3, weight, bias, H, W))
    ref3 = dwconv_reference(x3.astype(jnp.float32), weight, bias, H, W)
    assert out3.dtype == jnp.bfloat16
    assert jnp.allclose(out3.astype(jnp.float32), ref3, atol=3e-2, rtol=3e-2), \
        "mismatch (bf16)"

    print("KERNEL_OK")
</pallas_src>

<mosaic_0001>
module attributes {stable_mosaic.version = 11 : i64} {
  func.func @_dwconv_kernel(%arg0: i32, %arg1: i32, %arg2: i32, %arg3: memref<1x4x16x128xf32, #tpu.memory_space<vmem>>, %arg4: memref<1x1x16x128xf32, #tpu.memory_space<vmem>>, %arg5: memref<1x1x16x128xf32, #tpu.memory_space<vmem>>, %arg6: memref<3x3x128xf32, #tpu.memory_space<vmem>>, %arg7: memref<1x128xf32, #tpu.memory_space<vmem>>, %arg8: memref<1x4x16x128xf32, #tpu.memory_space<vmem>>, %arg9: memref<6x16x128xf32, #tpu.memory_space<vmem>>) attributes {dimension_semantics = [#tpu.dimension_semantics<parallel>, #tpu.dimension_semantics<parallel>, #tpu.dimension_semantics<parallel>], iteration_bounds = array<i64: 2, 2, 4>, scalar_prefetch = 0 : i64, scratch_operands = 1 : i64, tpu.core_type = #tpu.core_type<tc>, window_params = [{transform_indices = @transform_0, window_bounds = array<i64: 1, 4, 16, 128>}, {transform_indices = @transform_1, window_bounds = array<i64: 1, 1, 16, 128>}, {transform_indices = @transform_2, window_bounds = array<i64: 1, 1, 16, 128>}, {transform_indices = @transform_3, window_bounds = array<i64: 3, 3, 128>}, {transform_indices = @transform_4, window_bounds = array<i64: 1, 128>}, {transform_indices = @transform_5, window_bounds = array<i64: 1, 4, 16, 128>}]} {
    %c0_i32 = arith.constant 0 : i32
    %0 = arith.cmpi sgt, %arg2, %c0_i32 : i32
    %1 = arith.extui %0 : i1 to i32
    %2 = arith.sitofp %1 : i32 to f32
    %c3_i32 = arith.constant 3 : i32
    %3 = arith.cmpi slt, %arg2, %c3_i32 : i32
    %4 = arith.extui %3 : i1 to i32
    %5 = arith.sitofp %4 : i32 to f32
    %c0 = arith.constant 0 : index
    %c0_0 = arith.constant 0 : index
    %c0_1 = arith.constant 0 : index
    %c0_2 = arith.constant 0 : index
    %6 = vector.load %arg3[%c0, %c0_0, %c0_1, %c0_2] : memref<1x4x16x128xf32, #tpu.memory_space<vmem>>, vector<1x4x16x128xf32>
    %7 = vector.shape_cast %6 : vector<1x4x16x128xf32> to vector<4x16x128xf32>
    %c1 = arith.constant 1 : index
    %c0_3 = arith.constant 0 : index
    %c0_4 = arith.constant 0 : index
    %8 = vector.load %arg9[%c1, %c0_3, %c0_4] : memref<6x16x128xf32, #tpu.memory_space<vmem>>, vector<4x16x128xf32>
    tpu.vector_store %arg9[%c1, %c0_3, %c0_4], %7 {strides = array<i32>} : memref<6x16x128xf32, #tpu.memory_space<vmem>>, vector<4x16x128xf32>,
    %c0_5 = arith.constant 0 : index
    %c0_6 = arith.constant 0 : index
    %c0_7 = arith.constant 0 : index
    %c0_8 = arith.constant 0 : index
    %9 = vector.load %arg4[%c0_5, %c0_6, %c0_7, %c0_8] : memref<1x1x16x128xf32, #tpu.memory_space<vmem>>, vector<1x1x16x128xf32>
    %10 = vector.shape_cast %9 : vector<1x1x16x128xf32> to vector<1x16x128xf32>
    %11 = vector.broadcast %2 : f32 to vector<1x16x128xf32>
    %12 = arith.mulf %10, %11 : vector<1x16x128xf32>
    %c0_9 = arith.constant 0 : index
    %c0_10 = arith.constant 0 : index
    %c0_11 = arith.constant 0 : index
    %13 = vector.load %arg9[%c0_9, %c0_10, %c0_11] : memref<6x16x128xf32, #tpu.memory_space<vmem>>, vector<1x16x128xf32>
    tpu.vector_store %arg9[%c0_9, %c0_10, %c0_11], %12 {strides = array<i32>} : memref<6x16x128xf32, #tpu.memory_space<vmem>>, vector<1x16x128xf32>,
    %c0_12 = arith.constant 0 : index
    %c0_13 = arith.constant 0 : index
    %c0_14 = arith.constant 0 : index
    %c0_15 = arith.constant 0 : index
    %14 = vector.load %arg5[%c0_12, %c0_13, %c0_14, %c0_15] : memref<1x1x16x128xf32, #tpu.memory_space<vmem>>, vector<1x1x16x128xf32>
    %15 = vector.shape_cast %14 : vector<1x1x16x128xf32> to vector<1x16x128xf32>
    %16 = vector.broadcast %5 : f32 to vector<1x16x128xf32>
    %17 = arith.mulf %15, %16 : vector<1x16x128xf32>
    %c5 = arith.constant 5 : index
    %c0_16 = arith.constant 0 : index
    %c0_17 = arith.constant 0 : index
    %18 = vector.load %arg9[%c5, %c0_16, %c0_17] : memref<6x16x128xf32, #tpu.memory_space<vmem>>, vector<1x16x128xf32>
    tpu.vector_store %arg9[%c5, %c0_16, %c0_17], %17 {strides = array<i32>} : memref<6x16x128xf32, #tpu.memory_space<vmem>>, vector<1x16x128xf32>,
    %c0_18 = arith.constant 0 : index
    %c0_19 = arith.constant 0 : index
    %c0_20 = arith.constant 0 : index
    %19 = vector.load %arg6[%c0_18, %c0_19, %c0_20] : memref<3x3x128xf32, #tpu.memory_space<vmem>>, vector<3x3x128xf32>
    %c0_21 = arith.constant 0 : index
    %c0_22 = arith.constant 0 : index
    %20 = vector.load %arg7[%c0_21, %c0_22] : memref<1x128xf32, #tpu.memory_space<vmem>>, vector<1x128xf32>
    %21 = vector.shape_cast %20 : vector<1x128xf32> to vector<128xf32>
    %c0_23 = arith.constant 0 : index
    %c0_24 = arith.constant 0 : index
    %c0_25 = arith.constant 0 : index
    %22 = vector.load %arg9[%c0_23, %c0_24, %c0_25] : memref<6x16x128xf32, #tpu.memory_space<vmem>>, vector<4x16x128xf32>
    %c2 = arith.constant 2 : index
    %c0_26 = arith.constant 0 : index
    %c0_27 = arith.constant 0 : index
    %23 = vector.load %arg9[%c2, %c0_26, %c0_27] : memref<6x16x128xf32, #tpu.memory_space<vmem>>, vector<4x16x128xf32>
    %24 = vector.extract_strided_slice %19 {offsets = [0, 0, 0], sizes = [1, 1, 128], strides = [1, 1, 1]} : vector<3x3x128xf32> to vector<1x1x128xf32>
    %25 = vector.shape_cast %24 : vector<1x1x128xf32> to vector<128xf32>
    %26 = vector.shape_cast %25 : vector<128xf32> to vector<1x1x128xf32>
    %27 = vector.broadcast %26 : vector<1x1x128xf32> to vector<4x16x128xf32>
    %28 = arith.mulf %22, %27 : vector<4x16x128xf32>
    %29 = vector.extract_strided_slice %19 {offsets = [1, 0, 0], sizes = [1, 1, 128], strides = [1, 1, 1]} : vector<3x3x128xf32> to vector<1x1x128xf32>
    %30 = vector.shape_cast %29 : vector<1x1x128xf32> to vector<128xf32>
    %31 = vector.shape_cast %30 : vector<128xf32> to vector<1x1x128xf32>
    %32 = vector.broadcast %31 : vector<1x1x128xf32> to vector<4x16x128xf32>
    %33 = arith.mulf %7, %32 : vector<4x16x128xf32>
    %34 = arith.addf %28, %33 : vector<4x16x128xf32>
    %35 = vector.extract_strided_slice %19 {offsets = [2, 0, 0], sizes = [1, 1, 128], strides = [1, 1, 1]} : vector<3x3x128xf32> to vector<1x1x128xf32>
    %36 = vector.shape_cast %35 : vector<1x1x128xf32> to vector<128xf32>
    %37 = vector.shape_cast %36 : vector<128xf32> to vector<1x1x128xf32>
    %38 = vector.broadcast %37 : vector<1x1x128xf32> to vector<4x16x128xf32>
    %39 = arith.mulf %23, %38 : vector<4x16x128xf32>
    %40 = arith.addf %34, %39 : vector<4x16x128xf32>
    %41 = vector.extract_strided_slice %19 {offsets = [0, 1, 0], sizes = [1, 1, 128], strides = [1, 1, 1]} : vector<3x3x128xf32> to vector<1x1x128xf32>
    %42 = vector.shape_cast %41 : vector<1x1x128xf32> to vector<128xf32>
    %43 = vector.shape_cast %42 : vector<128xf32> to vector<1x1x128xf32>
    %44 = vector.broadcast %43 : vector<1x1x128xf32> to vector<4x16x128xf32>
    %45 = arith.mulf %22, %44 : vector<4x16x128xf32>
    %46 = vector.extract_strided_slice %19 {offsets = [1, 1, 0], sizes = [1, 1, 128], strides = [1, 1, 1]} : vector<3x3x128xf32> to vector<1x1x128xf32>
    %47 = vector.shape_cast %46 : vector<1x1x128xf32> to vector<128xf32>
    %48 = vector.shape_cast %47 : vector<128xf32> to vector<1x1x128xf32>
    %49 = vector.broadcast %48 : vector<1x1x128xf32> to vector<4x16x128xf32>
    %50 = arith.mulf %7, %49 : vector<4x16x128xf32>
    %51 = arith.addf %45, %50 : vector<4x16x128xf32>
    %52 = vector.extract_strided_slice %19 {offsets = [2, 1, 0], sizes = [1, 1, 128], strides = [1, 1, 1]} : vector<3x3x128xf32> to vector<1x1x128xf32>
    %53 = vector.shape_cast %52 : vector<1x1x128xf32> to vector<128xf32>
    %54 = vector.shape_cast %53 : vector<128xf32> to vector<1x1x128xf32>
    %55 = vector.broadcast %54 : vector<1x1x128xf32> to vector<4x16x128xf32>
    %56 = arith.mulf %23, %55 : vector<4x16x128xf32>
    %57 = arith.addf %51, %56 : vector<4x16x128xf32>
    %58 = vector.extract_strided_slice %19 {offsets = [0, 2, 0], sizes = [1, 1, 128], strides = [1, 1, 1]} : vector<3x3x128xf32> to vector<1x1x128xf32>
    %59 = vector.shape_cast %58 : vector<1x1x128xf32> to vector<128xf32>
    %60 = vector.shape_cast %59 : vector<128xf32> to vector<1x1x128xf32>
    %61 = vector.broadcast %60 : vector<1x1x128xf32> to vector<4x16x128xf32>
    %62 = arith.mulf %22, %61 : vector<4x16x128xf32>
    %63 = vector.extract_strided_slice %19 {offsets = [1, 2, 0], sizes = [1, 1, 128], strides = [1, 1, 1]} : vector<3x3x128xf32> to vector<1x1x128xf32>
    %64 = vector.shape_cast %63 : vector<1x1x128xf32> to vector<128xf32>
    %65 = vector.shape_cast %64 : vector<128xf32> to vector<1x1x128xf32>
    %66 = vector.broadcast %65 : vector<1x1x128xf32> to vector<4x16x128xf32>
    %67 = arith.mulf %7, %66 : vector<4x16x128xf32>
    %68 = arith.addf %62, %67 : vector<4x16x128xf32>
    %69 = vector.extract_strided_slice %19 {offsets = [2, 2, 0], sizes = [1, 1, 128], strides = [1, 1, 1]} : vector<3x3x128xf32> to vector<1x1x128xf32>
    %70 = vector.shape_cast %69 : vector<1x1x128xf32> to vector<128xf32>
    %71 = vector.shape_cast %70 : vector<128xf32> to vector<1x1x128xf32>
    %72 = vector.broadcast %71 : vector<1x1x128xf32> to vector<4x16x128xf32>
    %73 = arith.mulf %23, %72 : vector<4x16x128xf32>
    %74 = arith.addf %68, %73 : vector<4x16x128xf32>
    %c1_i32 = arith.constant 1 : i32
    %75 = tpu.dynamic_rotate %40 by %c1_i32 dim 1 : vector<4x16x128xf32>, i32 -> vector<4x16x128xf32>
    %c15_i32 = arith.constant 15 : i32
    %76 = tpu.dynamic_rotate %74 by %c15_i32 dim 1 : vector<4x16x128xf32>, i32 -> vector<4x16x128xf32>
    %77 = tpu.iota {dimensions = array<i32: 1>} : vector<4x16x128xi32>
    %c0_i32_28 = arith.constant 0 : i32
    %78 = vector.broadcast %c0_i32_28 : i32 to vector<4x16x128xi32>
    %79 = arith.cmpi eq, %77, %78 : vector<4x16x128xi32>
    %cst = arith.constant 0.000000e+00 : f32
    %80 = vector.broadcast %cst : f32 to vector<4x16x128xf32>
    %81 = arith.select %79, %80, %75 : vector<4x16x128xi1>, vector<4x16x128xf32>
    %c15_i32_29 = arith.constant 15 : i32
    %82 = vector.broadcast %c15_i32_29 : i32 to vector<4x16x128xi32>
    %83 = arith.cmpi eq, %77, %82 : vector<4x16x128xi32>
    %cst_30 = arith.constant 0.000000e+00 : f32
    %84 = vector.broadcast %cst_30 : f32 to vector<4x16x128xf32>
    %85 = arith.select %83, %84, %76 : vector<4x16x128xi1>, vector<4x16x128xf32>
    %86 = vector.shape_cast %21 : vector<128xf32> to vector<1x1x128xf32>
    %87 = vector.broadcast %86 : vector<1x1x128xf32> to vector<4x16x128xf32>
    %88 = arith.addf %57, %87 : vector<4x16x128xf32>
    %89 = arith.addf %88, %81 : vector<4x16x128xf32>
    %90 = arith.addf %89, %85 : vector<4x16x128xf32>
    %c0_31 = arith.constant 0 : index
    %c0_32 = arith.constant 0 : index
    %c0_33 = arith.constant 0 : index
    %c0_34 = arith.constant 0 : index
    %91 = vector.load %arg8[%c0_31, %c0_32, %c0_33, %c0_34] : memref<1x4x16x128xf32, #tpu.memory_space<vmem>>, vector<1x4x16x128xf32>
    %92 = vector.shape_cast %91 : vector<1x4x16x128xf32> to vector<4x16x128xf32>
    %93 = vector.shape_cast %90 : vector<4x16x128xf32> to vector<1x4x16x128xf32>
    tpu.vector_store %arg8[%c0_31, %c0_32, %c0_33, %c0_34], %93 {strides = array<i32>} : memref<1x4x16x128xf32, #tpu.memory_space<vmem>>, vector<1x4x16x128xf32>,
    return
  }
  func.func @transform_0(%arg0: i32, %arg1: i32, %arg2: i32) -> (i32, i32, i32, i32) {
    %c0_i32 = arith.constant 0 : i32
    %c0_i32_0 = arith.constant 0 : i32
    return %arg0, %arg2, %c0_i32, %arg1 : i32, i32, i32, i32
  }
  func.func @transform_1(%arg0: i32, %arg1: i32, %arg2: i32) -> (i32, i32, i32, i32) {
    %c4_i32 = arith.constant 4 : i32
    %0 = arith.muli %arg2, %c4_i32 : i32
    %c1_i32 = arith.constant 1 : i32
    %1 = arith.subi %0, %c1_i32 : i32
    %c0_i32 = arith.constant 0 : i32
    %2 = arith.maxsi %1, %c0_i32 : i32
    %c0_i32_0 = arith.constant 0 : i32
    %c0_i32_1 = arith.constant 0 : i32
    return %arg0, %2, %c0_i32_0, %arg1 : i32, i32, i32, i32
  }
  func.func @transform_2(%arg0: i32, %arg1: i32, %arg2: i32) -> (i32, i32, i32, i32) {
    %c4_i32 = arith.constant 4 : i32
    %0 = arith.muli %arg2, %c4_i32 : i32
    %c4_i32_0 = arith.constant 4 : i32
    %1 = arith.addi %0, %c4_i32_0 : i32
    %c15_i32 = arith.constant 15 : i32
    %2 = arith.minsi %1, %c15_i32 : i32
    %c0_i32 = arith.constant 0 : i32
    %c0_i32_1 = arith.constant 0 : i32
    return %arg0, %2, %c0_i32, %arg1 : i32, i32, i32, i32
  }
  func.func @transform_3(%arg0: i32, %arg1: i32, %arg2: i32) -> (i32, i32, i32) {
    %c0_i32 = arith.constant 0 : i32
    %c0_i32_0 = arith.constant 0 : i32
    %c0_i32_1 = arith.constant 0 : i32
    return %c0_i32, %c0_i32_0, %arg1 : i32, i32, i32
  }
  func.func @transform_4(%arg0: i32, %arg1: i32, %arg2: i32) -> (i32, i32) {
    %c0_i32 = arith.constant 0 : i32
    %c0_i32_0 = arith.constant 0 : i32
    return %c0_i32, %arg1 : i32, i32
  }
  func.func @transform_5(%arg0: i32, %arg1: i32, %arg2: i32) -> (i32, i32, i32, i32) {
    %c0_i32 = arith.constant 0 : i32
    %c0_i32_0 = arith.constant 0 : i32
    return %arg0, %arg2, %c0_i32, %arg1 : i32, i32, i32, i32
  }
}

</mosaic_0001>

<bundles_post_ra>
// kernel: tpu_custom_call.1
= control target key start
LH: loop header
LB: loop body
LE: loop exit
PB: predicated region body
PF: predicated region fallthrough
CT: control target
= control target key end

     0   :  { %s2297_s0 = inlined_call_operand.hbm [shape: f32[2,16,16,256], index: 0, kind: input, shape index: {}]   ;;  %s2298_s1 = inlined_call_operand.hbm [shape: f32[2,16,16,256], index: 1, kind: input, shape index: {}]   ;;  %s2299_s2 = inlined_call_operand.hbm [shape: f32[2,16,16,256], index: 2, kind: input, shape index: {}]   ;;  %s2300_s3 = inlined_call_operand.hbm [shape: f32[3,3,256], index: 3, kind: input, shape index: {}]   ;;  %s2301_s4 = inlined_call_operand.vmem [shape: f32[1,256], index: 4, kind: input, shape index: {}]   ;;  %s2302_s5 = inlined_call_operand.hbm [shape: f32[2,16,16,256], index: 5, kind: output, shape index: {}]  }
   0x1   :  { %2336 = sst [smem:[#allocation41_spill]] %s2297_s0 }
   0x2   :  { %2337 = sst [smem:[#allocation42_spill]] %s2298_s1 }
   0x3   :  { %2338 = sst [smem:[#allocation43_spill]] %s2299_s2 }
   0x4   :  { %2339 = sst [smem:[#allocation44_spill]] %s2300_s3 }
   0x5   :  { %2340 = sst [smem:[#allocation45_spill]] %s2301_s4 }
   0x6   :  { %2341 = sst [smem:[#allocation46_spill]] %s2302_s5 }
   0x7   :  { %10 = vsyncpa [#allocation4], 0 }
   0x8   :  { %12 = vsyncpa [#allocation4 + $0x1], 0 }
   0x9   :  { %13 = vsyncpa [#allocation7], 0 }
   0xa   :  { %15 = vsyncpa [#allocation7 + $0x1], 0 }
   0xb   :  { %16 = vsyncpa [#allocation10], 0 }
   0xc   :  { %18 = vsyncpa [#allocation10 + $0x1], 0 }
   0xd   :  { %19 = vsyncpa [#allocation5], 0 }
   0xe   :  { %21 = vsyncpa [#allocation5 + $0x1], 0  ;;  %s1547_s18 = smov 0   ;;  %s1549_s19 = smov 0  }
   0xf   :  { %s1551_s20 = smov 0   ;;  %s1553_s21 = smov 0  }
  0x10   :  { %s1555_s22 = smov 0   ;;  %s1557_s23 = smov 0  }
  0x11   :  { %s1559_s24 = smov 0   ;;  %s1561_s25 = smov 0  }
  0x12   :  { %s1563_s26 = smov 0   ;;  %s1565_s27 = smov 0  }
  0x13   :  { %s1567_s28 = smov 0   ;;  %s1569_s29 = smov 0  }
  0x14   :  { %s1571_s30 = smov 0   ;;  %s1573_s6 = smov 0  }
  0x15   :  { %s1575_s7 = smov 0   ;;  %s1577_s8 = smov 0  }
  0x16   :  { %s1579_s9 = smov 0   ;;  %s1581_s10 = smov 0  }
  0x17   :  { %s1583_s11 = smov 0  }
  0x18 LB: > { %2342 = sst [smem:[#allocation17_spill]] %s1430_s18  ;;  %s1643_s12 = sadd.s32 4294967295, %s1502_s11   ;;  %s1502_s11 = sphi %s1583_s11, %s27_s11   ;;  %s1498_s10 = sphi %s1581_s10, %s2436_s10   ;;  %s1494_s9 = sphi %s1579_s9, %s2442_s9   ;;  %s1490_s8 = sphi %s1577_s8, %s2433_s8   ;;  %s1486_s7 = sphi %s1575_s7, %s2432_s7   ;;  %s1482_s6 = sphi %s1573_s6, %s2441_s6   ;;  %s1478_s30 = sphi %s1571_s30, %s2431_s30   ;;  %s1474_s29 = sphi %s1569_s29, %s2430_s29   ;;  %s1470_s28 = sphi %s1567_s28, %s2440_s28   ;;  %s1466_s27 = sphi %s1565_s27, %s2439_s27   ;;  %s1462_s26 = sphi %s1563_s26, %s2428_s26   ;;  %s1458_s25 = sphi %s1561_s25, %s2427_s25   ;;  %s1454_s24 = sphi %s1559_s24, %s2426_s24   ;;  %s1450_s23 = sphi %s1557_s23, %s2438_s23   ;;  %s1446_s22 = sphi %s1555_s22, %s2425_s22   ;;  %s1442_s21 = sphi %s1553_s21, %s2424_s21   ;;  %s1438_s20 = sphi %s1551_s20, %s2437_s20   ;;  %s1434_s19 = sphi %s1549_s19, %s2435_s19   ;;  %s1430_s18 = sphi %s1547_s18, %s2421_s18  }
  0x19   : > { %2343 = sst [smem:[#allocation18_spill]] %s1434_s19  ;;  %s39_s13 = sadd.s32 1, %s1490_s8 }
  0x1a   : > { %2344 = sst [smem:[#allocation19_spill]] %s1438_s20  ;;  %p40_p0 = scmp.ge.s32.totalorder %s39_s13, 4 }
  0x1b   : > { %2345 = sst [smem:[#allocation20_spill]] %s1442_s21  ;;  %s42_s14 = sadd.s32 1, %s1494_s9 }
  0x1c   : > { %2346 = sst [smem:[#allocation21_spill]] %s1446_s22  ;;  %s46_s15 = sadd.s32 1, %s1498_s10 }
  0x1d   : > { %2347 = sst [smem:[#allocation22_spill]] %s1450_s23  ;;  %p2327_p1 = scmp.eq.s32.totalorder %s1502_s11, 0 }
  0x1e   : > { %2348 = sst [smem:[#allocation23_spill]] %s1458_s25  ;;  %s2444_s13 = smov (%p40_p0, %s39_s13), 0 }
  0x1f   : > { %2349 = sst [smem:[#allocation24_spill]] %s1462_s26  ;;  %s2446_s14 = smov (!%p40_p0, %s42_s14), %s1494_s9 }
  0x20   : > { %2350 = sst [smem:[#allocation25_spill]] %s1466_s27  ;;  %s51_s16 = ssub.s32 %s1490_s8, %s2444_s13 }
  0x21   : > { %2351 = sst [smem:[#allocation26_spill]] %s1474_s29  ;;  %p2319_p2 = scmp.eq.s32.totalorder %s1643_s12, 0 }
  0x22   : > { %2352 = sst [smem:[#allocation27_spill]] %s1478_s30  ;;  %p44_p3 = scmp.ge.s32.totalorder %s2446_s14, 2 }
  0x23   : > { %2353 = sst [smem:[#allocation28_spill]] %s1482_s6  ;;  %s963_s17 = sshll.u32 %s1490_s8, 2 }
  0x24   : > { %2354 = sst [smem:[#allocation29_spill]] %s1486_s7  ;;  %s964_s5 = sadd.s32 4294967295, %s963_s17 }
  0x25   : > { %2355 = sst [smem:[#allocation30_spill]] %s1490_s8  ;;  %s965_s7 = sshll.u32 %s2444_s13, 2 }
  0x26   : > { %2356 = sst [smem:[#allocation31_spill]] %s1498_s10  ;;  %s2448_s14 = smov (%p44_p3, %s2446_s14), 0 }
  0x27   : > { %2357 = sst [smem:[#allocation32_spill]] %s2444_s13  ;;  %s2450_s15 = smov (!%p44_p3, %s46_s15), %s1498_s10 }
  0x28   : > { %2358 = sst [smem:[#allocation33_spill]] %s2448_s14  ;;  %s1662_s4 = ssub.s32 %s1494_s9, %s2448_s14 }
  0x29   : > { %p82_p4 = scmp.gt.s32.totalorder %s964_s5, 0  ;;  %p48_p5 = scmp.ge.s32.totalorder %s2450_s15, 2 }
  0x2a   : > { %s966_s6 = sadd.s32 4294967295, %s965_s7  ;;  %s95_s13 = sadd.s32 1, %s1462_s26 }
  0x2b   : > { %s2452_s5 = smov (!%p82_p4, %s964_s5), 0  ;;  %s2454_s15 = smov (%p48_p5, %s2450_s15), 0 }
  0x2c   : > { %2359 = sst [smem:[#allocation34_spill]] %s2454_s15  ;;  %p86_p6 = scmp.gt.s32.totalorder %s966_s6, 0 }
  0x2d   : > { %s1671_s30 = ssub.s32 %s1498_s10, %s2454_s15  ;;  %p102_p7 = scmp.ne.s32.totalorder %s1462_s26, %s1458_s25 }
  0x2e   : > { %2360 = sst [smem:[#allocation35_spill]] %s1671_s30  ;;  %s52_s14 = sor.u32 %s51_s16, %s1671_s30 }
  0x2f   : > { %p108_p8 = scmp.ne.s32.totalorder %s1458_s25, %s1454_s24  ;;  %s54_s3 = sor.u32 %s1662_s4, %s52_s14 }
  0x30   : > { %p1681_p9 = por %p102_p7, %p2327_p1  ;;  %p1685_p10 = scmp.eq.s32.totalorder %s54_s3, 0 }
  0x31   : > { %p1691_p11 = por %p108_p8, %p2319_p2  ;;  %s2456_s6 = smov (!%p86_p6, %s966_s6), 0 }
  0x32   : > { %s1695_s24 = sadd.s32 4, %s963_s17  ;;  %s1697_s14 = sadd.s32 4, %s965_s7 }
  0x33   : > { %s2363_s15 = scalar_select %p1691_p11, 1, 0 }
  0x34   : > { %s89_s16 = ssub.s32 %s2452_s5, %s2456_s6  ;;  %p2318_p3 = scmp.lt.s32.totalorder %s1502_s11, 16 }
  0x35   : > { %2364 = sst [smem:[#allocation36_spill]] %s2363_s15  ;;  %s90_s3 = sor.u32 %s89_s16, %s1671_s30 }
  0x36   : > { %s92_s25 = sor.u32 %s90_s3, %s1662_s4  ;;  %s1706_s15 = sshll.u32 %s1498_s10, 6 }
  0x37   : > { %p93_p0 = scmp.eq.s32.totalorder %s92_s25, 0  ;;  %s277_s20 = sand.u32 1, %s1502_s11  }
  0x38   : > { %s279_s7 = sand.u32 1, %s1462_s26   ;;  %s979_s21 = sshll.u32 %s2452_s5, 2 }
  0x39   : > { %s1709_s17 = scalar_select %p93_p0, %s1462_s26, %s95_s13  }
  0x3a   : > { %s976_s2 = sshll.u32 %s279_s7, 4  ;;  %s290_s6 = sadd.s32 %s1494_s9, %s979_s21 }
  0x3b   : > { %2365 = sst [smem:[#allocation37_spill]] %s1709_s17  ;;  %s281_s22 = scalar_lea.vmem [#allocation6], %s976_s2 }
  0x3c   : > { %s295_s16 = sshll.u32 %s281_s22, 4  ;;  %s292_s30 = sadd.s32 %s1706_s15, %s290_s6  ;;  %s296_s16 = int_to_ptr.vmem [resolvable:$true] %s295_s16 }
  0x3d   : > { %s981_s23 = sshll.u32 %s292_s30, 7  ;;  %p1720_p4 = pnand %p2318_p3, %p1681_p9 }
  0x3e   : > { %s2367_s1 = sld [smem:[#allocation42_spill]]  ;;  %p988_p5 = scmp.ge.s32.totalorder %s1502_s11, 1 }
  0x3f   : > { %p357_p6 = scmp.lt.s32.totalorder %s1502_s11, 17  ;;  %s1729_s5 = scalar_lea.sflag [#allocation7], %s277_s20 }
  0x40   : > { %p1196_p7 = pneg %p1720_p4  ;;  %s1207_s2 = scalar_lea.vmem %s296_s16, 256 }
  0x41   : > { %p1208_p8 = scmp.ne.s32.totalorder %s296_s16, %s1207_s2  ;;  %s1504_s18 = smov [#allocation6]  }
  0x42   : > { %s1212_s21 = sshll.u32 %s1504_s18, 4  ;;  %s1213_s21 = int_to_ptr.vmem [resolvable:$false] %s1212_s21 }
  0x43   : > { %p1210_p0 = pnand %p1208_p8, %p1196_p7  ;;  %s1214_s22 = scalar_lea.vmem %s1213_s21, 512 }
  0x44   : > { %s294_s13 = scalar_lea.hbm %s2367_s1, %s981_s23  ;;  %p1215_p9 = scmp.lt.s32.totalorder %s296_s16, %s1213_s21 }
  0x45   : > { %p1211_p13 = pneg %p1210_p0  ;;  %p1216_p12 = scmp.lt.s32.totalorder %s1214_s22, %s1207_s2 }
  0x47   : > { %p1217_p3 = por %p1216_p12, %p1215_p9 }
  0x49   : > { %p1218_p2 = pnand %p1217_p3, %p1211_p13 }
  0x4b   : > { %1221 = shalt.err (!%p1218_p2)
}
  0x4c   : > { %s2320_s23 = smov 256   ;;  %s2322_s20 = smov 128  }
  0x4d   : > { %s2324_s30 = smov 8   ;;  %p1743_p2 = pnand %p988_p5, %p357_p6 }
  0x4e   : > { %1021 = dma.hbm_to_vmem [thread:$0]  (!%p1720_p4), %s294_s13, 256, %s296_s16, %s1729_s5, %s2320_s23, %s2322_s20, %s2324_s30  }
  0x4f   : > { %s962_s7 = sadd.s32 4294967294, %s1502_s11   ;;  %s57_s6 = sadd.s32 1, %s1474_s29 }
  0x50   : > { %p64_p12 = scmp.ne.s32.totalorder %s1474_s29, %s1470_s28  ;;  %p70_p3 = scmp.ne.s32.totalorder %s1470_s28, %s1466_s27 }
  0x51   : > { %s1754_s3 = scalar_select %p1685_p10, %s1474_s29, %s57_s6  }
  0x52   : > { %p1758_p13 = por %p2327_p1, %p64_p12  ;;  %p226_p4 = scmp.eq.s32.totalorder %s1643_s12, 15 }
  0x53   : > { %2369 = sst [smem:[#allocation38_spill]] %s1754_s3  ;;  %p232_p5 = scmp.eq.s32.totalorder %s962_s7, 15 }
  0x54   : > { %p2371_p6 = scmp.eq.s32.totalorder %s1643_s12, 0  ;;  %s252_s13 = sand.u32 1, %s1474_s29  }
  0x55   : > { %p1772_p8 = por %p226_p4, %p64_p12  ;;  %p1776_p10 = por %p232_p5, %p70_p3 }
  0x56   : > { %p1767_p7 = por %p2371_p6, %p70_p3  ;;  %s971_s18 = sshll.u32 %s252_s13, 6 }
  0x57   : > { %s2373_s19 = scalar_select %p1772_p8, 1, 0 }
  0x58   : > { %s2375_s2 = scalar_select %p1776_p10, 1, 0 }
  0x59   : > { %2374 = sst [smem:[#allocation39_spill]] %s2373_s19  ;;  %s1001_s21 = sshll.u32 %s1490_s8, 4 }
  0x5a   : > { %2376 = sst [smem:[#allocation40_spill]] %s2375_s2  ;;  %s262_s22 = sadd.s32 %s1494_s9, %s1001_s21 }
  0x5b   : > { %s256_s6 = scalar_lea.vmem [#allocation3], %s971_s18  ;;  %s264_s7 = sadd.s32 %s1706_s15, %s262_s22 }
  0x5c   : > { %s267_s23 = sshll.u32 %s256_s6, 4  ;;  %s975_s20 = sshll.u32 %s264_s7, 7  ;;  %s268_s23 = int_to_ptr.vmem [resolvable:$true] %s267_s23 }
  0x5d   : > { %p2377_p0 = scmp.lt.s32.totalorder %s1502_s11, 16  ;;  %s2379_s0 = sld [smem:[#allocation41_spill]] }
  0x5e   : > { %s253_s17 = scalar_lea.sflag [#allocation4], %s252_s13  ;;  %s1235_s21 = scalar_lea.vmem %s268_s23, 1024 }
  0x5f   : > { %p1787_p9 = pnand %p2377_p0, %p1758_p13  ;;  %p1236_p3 = scmp.ne.s32.totalorder %s268_s23, %s1235_s21 }
  0x60   : > { %s1508_s18 = smov [#allocation3]  }
  0x61   : > { %p1224_p12 = pneg %p1787_p9  ;;  %s1240_s22 = sshll.u32 %s1508_s18, 4  ;;  %s1241_s22 = int_to_ptr.vmem [resolvable:$false] %s1240_s22 }
  0x62   : > { %s1242_s25 = scalar_lea.vmem %s1241_s22, 2048  ;;  %p1243_p13 = scmp.lt.s32.totalorder %s268_s23, %s1241_s22 }
  0x63   : > { %s266_s29 = scalar_lea.hbm %s2379_s0, %s975_s20  ;;  %p1238_p4 = pnand %p1236_p3, %p1224_p12 }
  0x64   : > { %p1244_p6 = scmp.lt.s32.totalorder %s1242_s25, %s1235_s21 }
  0x65   : > { %p1239_p5 = pneg %p1238_p4 }
  0x66   : > { %p1245_p0 = por %p1244_p6, %p1243_p13 }
  0x68   : > { %p1246_p1 = pnand %p1245_p0, %p1239_p5 }
  0x6a   : > { %1249 = shalt.err (!%p1246_p1)
}
  0x6b   : > { %s2380_s1 = smov 8   ;;  %s2381_s20 = smov 128  }
  0x6c   : > { %s2382_s3 = smov 256   ;;  %s2383_s13 = sld [smem:[#allocation22_spill]] }
  0x6d   : > { %s2384_s6 = sld [smem:[#allocation21_spill]]  ;;  %p2387_p1 = scmp.lt.s32.totalorder %s1695_s24, 15 }
  0x6e   : > { %s2385_s7 = sld [smem:[#allocation20_spill]]  ;;  %p2388_p12 = scmp.lt.s32.totalorder %s1697_s14, 15 }
  0x6f   : > { %s2386_s18 = sld [smem:[#allocation35_spill]]  ;;  %s2458_s24 = smov (!%p2387_p1, %s1695_s24), 15 }
  0x70   : > { %1018 = dma.hbm_to_vmem [thread:$0]  (!%p1787_p9), %s266_s29, 1024, %s268_s23, %s253_s17, %s2382_s3, %s2381_s20, %s2380_s1  }
  0x71   : > { %s2460_s14 = smov (!%p2388_p12, %s1697_s14), 15  ;;  %p2389_p5 = scmp.eq.s32.totalorder %s1502_s11, 0 }
  0x72   : > { %s133_s30 = sadd.s32 1, %s2383_s13  ;;  %s127_s21 = ssub.s32 %s2458_s24, %s2460_s14 }
  0x73   : > { %p140_p3 = scmp.ne.s32.totalorder %s2383_s13, %s2384_s6  ;;  %p2391_p9 = scmp.eq.s32.totalorder %s1643_s12, 0 }
  0x74   : > { %p146_p4 = scmp.ne.s32.totalorder %s2384_s6, %s2385_s7  ;;  %s307_s17 = sand.u32 1, %s2383_s13  }
  0x75   : > { %s128_s22 = sor.u32 %s127_s21, %s2386_s18  ;;  %p1815_p13 = por %p140_p3, %p2389_p5 }
  0x76   : > { %s130_s0 = sor.u32 %s128_s22, %s1662_s4  ;;  %p1822_p6 = por %p146_p4, %p2391_p9 }
  0x77   : > { %p131_p0 = scmp.eq.s32.totalorder %s130_s0, 0  ;;  %s982_s23 = sshll.u32 %s307_s17, 4 }
  0x78   : > { %s2392_s29 = scalar_select %p1822_p6, 1, 0 }
  0x79   : > { %s984_s8 = sshll.u32 %s2458_s24, 2  ;;  %s2462_s13 = smov (!%p131_p0, %s2383_s13), %s133_s30 }
  0x7a   : > { %s318_s14 = sadd.s32 %s1494_s9, %s984_s8  ;;  %s309_s7 = scalar_lea.vmem [#allocation8], %s982_s23 }
  0x7b   : > { %s320_s6 = sadd.s32 %s1706_s15, %s318_s14  ;;  %s323_s18 = sshll.u32 %s309_s7, 4  ;;  %s324_s18 = int_to_ptr.vmem [resolvable:$true] %s323_s18 }
  0x7c   : > { %s986_s21 = sshll.u32 %s320_s6, 7  ;;  %s2393_s22 = sld [smem:[#allocation43_spill]] }
  0x7d   : > { %p2394_p1 = scmp.lt.s32.totalorder %s1502_s11, 16  ;;  %s1263_s0 = scalar_lea.vmem %s324_s18, 256 }
  0x7e   : > { %p1264_p4 = scmp.ne.s32.totalorder %s324_s18, %s1263_s0  ;;  %s1509_s8 = smov [#allocation8]  }
  0x7f   : > { %p1839_p12 = pnand %p2394_p1, %p1815_p13  ;;  %s1268_s15 = sshll.u32 %s1509_s8, 4  ;;  %s1269_s15 = int_to_ptr.vmem [resolvable:$false] %s1268_s15 }
  0x80   : > { %s1270_s24 = scalar_lea.vmem %s1269_s15, 512  ;;  %p1271_p0 = scmp.lt.s32.totalorder %s324_s18, %s1269_s15 }
  0x81   : > { %p1252_p3 = pneg %p1839_p12  ;;  %p1272_p10 = scmp.lt.s32.totalorder %s1270_s24, %s1263_s0 }
  0x82   : > { %s322_s27 = scalar_lea.hbm %s2393_s22, %s986_s21 }
  0x83   : > { %p1266_p5 = pnand %p1264_p4, %p1252_p3  ;;  %p1273_p8 = por %p1272_p10, %p1271_p0 }
  0x85   : > { %p1267_p9 = pneg %p1266_p5 }
  0x87   : > { %p1274_p6 = pnand %p1273_p8, %p1267_p9 }
  0x89   : > { %1277 = shalt.err (!%p1274_p6)
}
  0x8a   : > { %s2396_s26 = sld [smem:[#allocation19_spill]]  ;;  %p157_p8 = scmp.eq.s32.totalorder %s1662_s4, 0 }
  0x8b   : > { %s2397_s2 = sld [smem:[#allocation18_spill]]  ;;  %p2399_p13 = scmp.eq.s32.totalorder %s1502_s11, 0 }
  0x8c   : > { %s2398_s30 = sld [smem:[#allocation17_spill]]  ;;  %s987_s23 = sshll.u32 %s1494_s9, 6 }
  0x8d   : > { %1024 = dma.hbm_to_vmem [thread:$0]  (!%p1839_p12), %s322_s27, 256, %s324_s18, %s1729_s5, %s2382_s3, %s2381_s20, %s2380_s1  }
  0x8e   : > { %p2400_p3 = scmp.eq.s32.totalorder %s1643_s12, 0  ;;  %s2402_s22 = sld [smem:[#allocation44_spill]] }
  0x8f   : > { %p2403_p12 = scmp.lt.s32.totalorder %s1502_s11, 16  ;;  %s1510_s0 = smov [#allocation9]  }
  0x90   : > { %s159_s25 = sadd.s32 1, %s2396_s26  ;;  %s333_s17 = sand.u32 1, %s2396_s26  }
  0x91   : > { %p166_p10 = scmp.ne.s32.totalorder %s2396_s26, %s2397_s2  ;;  %s1003_s6 = smul.u32 12, %s333_s17 }
  0x92   : > { %s1856_s19 = scalar_select %p157_p8, %s2396_s26, %s159_s25  }
  0x93   : > { %p168_p6 = por %p166_p10, %p2399_p13  ;;  %p172_p1 = scmp.ne.s32.totalorder %s2397_s2, %s2398_s30 }
  0x94   : > { %s342_s27 = scalar_lea.hbm %s2402_s22, %s987_s23  ;;  %s337_s5 = scalar_lea.vmem [#allocation9], %s1003_s6 }
  0x95   : > { %p1866_p4 = por %p172_p1, %p2400_p3  ;;  %p1875_p5 = pnand %p2403_p12, %p168_p6 }
  0x96   : > { %s343_s1 = sshll.u32 %s337_s5, 4  ;;  %s334_s3 = scalar_lea.sflag [#allocation10], %s333_s17  ;;  %s344_s1 = int_to_ptr.vmem [resolvable:$true] %s343_s1 }
  0x97   : > { %p1280_p9 = pneg %p1875_p5  ;;  %s1291_s18 = scalar_lea.vmem %s344_s1, 192 }
  0x98   : > { %p1292_p0 = scmp.ne.s32.totalorder %s344_s1, %s1291_s18  ;;  %s1296_s8 = sshll.u32 %s1510_s0, 4  ;;  %s1297_s8 = int_to_ptr.vmem [resolvable:$false] %s1296_s8 }
  0x99   : > { %s1298_s15 = scalar_lea.vmem %s1297_s8, 384  ;;  %p1299_p13 = scmp.lt.s32.totalorder %s344_s1, %s1297_s8 }
  0x9a   : > { %p1294_p8 = pnand %p1292_p0, %p1280_p9  ;;  %p1300_p6 = scmp.lt.s32.totalorder %s1298_s15, %s1291_s18 }
  0x9c   : > { %p1295_p10 = pneg %p1294_p8  ;;  %p1301_p1 = por %p1300_p6, %p1299_p13 }
  0x9e   : > { %p1302_p3 = pnand %p1301_p1, %p1295_p10 }
  0xa0   : > { %1305 = shalt.err (!%p1302_p3)
}
  0xa1   : > { %s1511_s24 = smov 64   ;;  %s1512_s26 = smov 4  }
  0xa2   : > { %1027 = dma.hbm_to_vmem [thread:$0]  (!%p1875_p5), %s342_s27, 192, %s344_s1, %s334_s3, %s2381_s20, %s1511_s24, %s1512_s26  }
  0xa3   : > { %361 = sbr.rel (%p1743_p2) target bundleno = 279 (0x117), region = 40  ;;  %s1887_s2 = sand.u32 (!%p1743_p2), 1, %s1470_s28  }
  0xa4   : > { %s989_s30 = sshll.u32 (!%p1743_p2), %s1887_s2, 6  ;;  %s364_s25 = scalar_lea.sflag (!%p1743_p2), [#allocation4], %s1887_s2 }
  0xa5   : > { %s1893_s17 = scalar_lea.vmem (!%p1743_p2), [#allocation3], %s989_s30 }
  0xa8   : > { %1409 = dma.done.wait (%p1767_p7), %s364_s25, 1024  }
  0xa9   : > { %1411 = vsyncadd (%p1767_p7), %s364_s25, 4294966272  ;;  %s2405_s10 = sld [smem:[#allocation23_spill]]  ;;  %s372_s23 = sand.u32 1, %s1643_s12  }
  0xaa   : > { %s373_s21 = scalar_lea.sflag [#allocation7], %s372_s23 }
  0xaf   : > { %s374_s6 = sand.u32 1, %s2405_s10  }
  0xb0   : > { %s1901_s7 = sshll.u32 %s374_s6, 4 }
  0xb1   : > { %s376_s22 = scalar_lea.vmem [#allocation6], %s1901_s7 }
  0xb2   : > { %1413 = dma.done.wait (%p1691_p11), %s373_s21, 256  }
  0xb3   : > { %1415 = vsyncadd (%p1691_p11), %s373_s21, 4294967040  ;;  %s2407_s27 = sld [smem:[#allocation21_spill]]  ;;  %p2408_p2 = scmp.ne.s32.totalorder %s2392_s29, 0 }
  0xb9   : > { %s383_s4 = sand.u32 1, %s2407_s27  }
  0xba   : > { %s1909_s16 = sshll.u32 %s383_s4, 4 }
  0xbb   : > { %s385_s5 = scalar_lea.vmem [#allocation8], %s1909_s16 }
  0xbc   : > { %1417 = dma.done.wait (%p2408_p2), %s373_s21, 256  }
  0xbd   : > { %1419 = vsyncadd (%p2408_p2), %s373_s21, 4294967040  ;;  %s2409_s12 = sld [smem:[#allocation18_spill]] }
  0xc3   : > { %s390_s1 = sand.u32 1, %s2409_s12  }
  0xc4   : > { %s1004_s3 = smul.u32 12, %s390_s1  ;;  %s391_s18 = scalar_lea.sflag [#allocation10], %s390_s1 }
  0xc6   : > { %s394_s0 = scalar_lea.vmem [#allocation9], %s1004_s3 }
  0xc7   : > { %1421 = dma.done.wait (%p1866_p4), %s391_s18, 192  }
  0xc8   : > { %1423 = vsyncadd (%p1866_p4), %s391_s18, 4294967104  ;;  %s2410_s8 = sld [smem:[#allocation27_spill]]  ;;  %v511_v0 = vlaneseq  ;;  %v1928_v4 = vld [vmem:[%s1893_s17] sm:$0xff]  ;;  %v1935_v7 = vld [vmem:[%s1893_s17 + $0x8] sm:$0xff]  ;;  %s2046_s23 = scalar_lea.vmem [#allocation11], %s989_s30 }
  0xc9   : > { %s2411_s15 = sld [smem:[#allocation28_spill]]  ;;  %v475_v8 = vld [vmem:[%s376_s22] sm:$0xff]  ;;  %v476_v9 = vld [vmem:[%s376_s22 + $0x8] sm:$0xff]  ;;  %s780_s4 = sshll.u32 %s2046_s23, 4  ;;  %s2198_s4 = int_to_ptr.vmem [resolvable:$true] %s780_s4 }
  0xca   : > { %v1922_v1 = vshrl.u32 %v511_v0, 7  ;;  %v490_v13 = vld [vmem:[%s394_s0] sm:$0x7]  ;;  %v491_v14 = vld [vmem:[%s394_s0 + $0x4] sm:$0x7]  ;;  %v1962_v25 = vld [vmem:[%s1893_s17 + $0x18] sm:$0xff] }
  0xcb   : > { %v492_v15 = vld [vmem:[%s394_s0 + $0x8] sm:$0x7]  ;;  %s2412_s10 = sld [smem:[#allocation45_spill]]  ;;  %s763_s0 = scalar_lea.sflag [#allocation5], %s1887_s2 }
  0xcc   : > { %v513_v2 = vsub.s32 0, %v1922_v1  ;;  %v565_v3 = vsub.s32 1, %v1922_v1  ;;  %v617_v6 = vsub.s32 2, %v1922_v1  ;;  %v1938_v10 = vadd.s32 8, %v1922_v1  ;;  %v1959_v24 = vld [vmem:[%s1893_s17 + $0x10] sm:$0xff]  ;;  %s2413_s6 = sld [smem:[#allocation29_spill]] }
  0xcd   : > { %vm677_vm0 = vcmp.lt.s32.totalorder %v1922_v1, 1  ;;  %vm704_vm1 = vcmp.eq.s32.totalorder %v1922_v1, 0  ;;  %vm694_vm2 = vcmp.lt.s32.totalorder %v1922_v1, 7  ;;  %s2414_s16 = sld [smem:[#allocation39_spill]] }
  0xce   : > { %p452_p11 = scmp.gt.s32.totalorder %s2410_s8, 0  ;;  %v1941_v16 = vrot.slane %v490_v13, %v513_v2  ;;  %v1943_v17 = vrot.slane %v491_v14, %v513_v2  ;;  %v1945_v18 = vrot.slane %v492_v15, %v513_v2  ;;  %v1947_v19 = vrot.slane %v490_v13, %v565_v3  ;;  %p455_p4 = scmp.lt.s32.totalorder %s2410_s8, 3 }
  0xcf   : > { %p448_p7 = scmp.lt.s32.totalorder %s2411_s15, 1  ;;  %v1950_v20 = vrot.slane %v491_v14, %v565_v3  ;;  %v1952_v21 = vrot.slane %v492_v15, %v565_v3  ;;  %v1954_v22 = vrot.slane %v490_v13, %v617_v6  ;;  %v1956_v23 = vrot.slane %v491_v14, %v617_v6  ;;  %s1002_s7 = sshll.u32 %s2410_s8, 4 }
  0xd0   : > { %s453_s29 = scalar_select %p452_p11, 1, 0  ;;  %v527_v28 = vmul.f32 %v1943_v17, %v1928_v4  ;;  %v528_v29 = vmul.f32 %v1943_v17, %v1935_v7  ;;  %v547_v30 = vmul.f32 %v1945_v18, %v1959_v24  ;;  %v548_v31 = vmul.f32 %v1945_v18, %v1962_v25 }
  0xd1   : > { %s1932_s14 = scalar_select %p448_p7, %s2411_s15, 1  ;;  %v579_v33 = vmul.f32 %v1950_v20, %v1928_v4  ;;  %v599_v36 = vmul.f32 %v1952_v21, %v1959_v24  ;;  %vm715_vm3 = vcmp.eq.s32.totalorder %v1938_v10, 15  ;;  %v631_v40 = vmul.f32 %v1956_v23, %v1928_v4 }
  0xd2   : > { %s454_s24 = scvt.s32.f32 %s453_s29  ;;  %v632_v41 = vmul.f32 %v1956_v23, %v1935_v7  ;;  %v1993_v45 = vrot.slane %v492_v15, %v617_v6  ;;  %v580_v50 = vmul.f32 %v1950_v20, %v1935_v7  ;;  %v600_v57 = vmul.f32 %v1952_v21, %v1962_v25  ;;  %s775_s21 = sadd.s32 %s2411_s15, %s1002_s7 }
  0xd3   : > { %s450_s20 = scalar_lea.vmem %s2412_s10, %s1932_s14  ;;  %v517_v58 = vmul.f32 %v1941_v16, %v1928_v4  ;;  %v518_v2 = vmul.f32 %v1941_v16, %v1935_v7  ;;  %v529_v3 = vmul.f32 %v1943_v17, %v1959_v24  ;;  %s997_s22 = sshll.u32 %s2413_s6, 6 }
  0xd4   : > { %v477_v5 = vstv %s454_s24  ;;  %v1991_v42 = vld [vmem:[%s450_s20] ss:$0 sm:$0xff]  ;;  %v651_v51 = vmul.f32 %v1993_v45, %v1959_v24  ;;  %v652_v52 = vmul.f32 %v1993_v45, %v1962_v25  ;;  %s2103_s30 = scalar_select %p455_p4, 1, 0 }
  0xd5   : > { %v478_v11 = vmul.f32 %v477_v5, %v475_v8  ;;  %v479_v12 = vmul.f32 %v477_v5, %v476_v9  ;;  %v2018_v9 = vld [vmem:[%s1893_s17 + $0x20] sm:$0xff]  ;;  %v537_v14 = vadd.f32 %v529_v3, %v517_v58  ;;  %v2082_v3 = vld [vmem:[%s1893_s17 + $0x38] sm:$0xff]  ;;  %s777_s27 = sadd.s32 %s997_s22, %s775_s21  ;;  %s2415_s3 = sld [smem:[#allocation46_spill]] }
  0xd6   : > { %v549_v15 = vmul.f32 %v1945_v18, %v2018_v9  ;;  %s1306_s8 = scalar_lea.vmem %s2198_s4, 1024  ;;  %p2416_p5 = scmp.ne.s32.totalorder %s2414_s16, 0 }
  0xd7   : > { %v515_v26 = vmul.f32 %v1941_v16, %v478_v11  ;;  %v516_v27 = vmul.f32 %v1941_v16, %v479_v12  ;;  %v567_v32 = vmul.f32 %v1947_v19, %v478_v11  ;;  %v619_v37 = vmul.f32 %v1954_v22, %v478_v11  ;;  %v2021_v11 = vld [vmem:[%s1893_s17 + $0x28] sm:$0xff]  ;;  %p1307_p12 = scmp.ne.s32.totalorder %s2198_s4, %s1306_s8  ;;  %s1513_s15 = smov [#allocation11]  }
  0xd8   : > { %v620_v39 = vmul.f32 %v1954_v22, %v479_v12  ;;  %v568_v46 = vmul.f32 %v1947_v19, %v479_v12  ;;  %v530_v12 = vmul.f32 %v1943_v17, %v1962_v25  ;;  %s1310_s29 = sshll.u32 %s1513_s15, 4  ;;  %s1311_s29 = int_to_ptr.vmem [resolvable:$false] %s1310_s29 }
  0xd9   : > { %v535_v34 = vadd.f32 %v527_v28, %v515_v26  ;;  %v536_v35 = vadd.f32 %v528_v29, %v516_v27  ;;  %v587_v38 = vadd.f32 %v579_v33, %v567_v32  ;;  %v639_v48 = vadd.f32 %v631_v40, %v619_v37  ;;  %p1308_p9 = pnand %p1307_p12, %p2416_p5  ;;  %s1312_s24 = scalar_lea.vmem %s1311_s29, 2048 }
  0xda   : > { %v640_v49 = vadd.f32 %v632_v41, %v620_v39  ;;  %v588_v56 = vadd.f32 %v580_v50, %v568_v46  ;;  %v550_v26 = vmul.f32 %v1945_v18, %v2021_v11  ;;  %v538_v29 = vadd.f32 %v530_v12, %v518_v2  ;;  %v2079_v2 = vld [vmem:[%s1893_s17 + $0x30] sm:$0xff]  ;;  %s457_s17 = scvt.s32.f32 %s2103_s30  ;;  %p1313_p8 = scmp.lt.s32.totalorder %s2198_s4, %s1311_s29 }
  0xdb   : > { %v555_v43 = vadd.f32 %v547_v30, %v535_v34  ;;  %v556_v44 = vadd.f32 %v548_v31, %v536_v35  ;;  %v607_v47 = vadd.f32 %v599_v36, %v587_v38  ;;  %v659_v59 = vadd.f32 %v651_v51, %v639_v48  ;;  %p1309_p0 = pneg %p1308_p9  ;;  %p1314_p10 = scmp.lt.s32.totalorder %s1312_s24, %s1306_s8 }
  0xdc   : > { %v660_v60 = vadd.f32 %v652_v52, %v640_v49  ;;  %v608_v0 = vadd.f32 %v600_v57, %v588_v56  ;;  %v569_v30 = vmul.f32 %v1947_v19, %v1928_v4  ;;  %v557_v34 = vadd.f32 %v549_v15, %v537_v14 }
  0xdd   : > { %v667_v53 = vrot.slane %v555_v43, 7  ;;  %v671_v54 = vrot.slane %v556_v44, 7  ;;  %v730_v55 = vadd.f32 %v1991_v42, %v607_v47  ;;  %v686_v5 = vrot.slane %v659_v59, 1  ;;  %p1315_p13 = por %p1314_p10, %p1313_p8 }
  0xde   : > { %v690_v6 = vrot.slane %v660_v60, 1  ;;  %v731_v13 = vadd.f32 %v1991_v42, %v608_v0  ;;  %v558_v35 = vadd.f32 %v550_v26, %v538_v29  ;;  %v581_v36 = vmul.f32 %v1950_v20, %v1959_v24 }
  0xdf   : > { %v682_v61 = vsel %vm677_vm0, %v671_v54, %v667_v53  ;;  %v678_v62 = vsel %vm677_vm0, %v667_v53, %v671_v54  ;;  %v601_v37 = vmul.f32 %v1952_v21, %v2018_v9  ;;  %v621_v38 = vmul.f32 %v1954_v22, %v1928_v4  ;;  %p1316_p6 = pnand %p1315_p13, %p1309_p0 }
  0xe0   : > { %v706_v63 = vsel %vm704_vm1, 0.0, %v682_v61  ;;  %v695_v27 = vsel %vm694_vm2, %v686_v5, %v690_v6  ;;  %v699_v28 = vsel %vm694_vm2, %v690_v6, %v686_v5  ;;  %v739_v33 = vadd.f32 %v731_v13, %v678_v62 }
  0xe1   : > { %v738_v8 = vadd.f32 %v730_v55, %v706_v63  ;;  %v717_v32 = vsel %vm715_vm3, 0.0, %v699_v28  ;;  %v622_v40 = vmul.f32 %v1954_v22, %v1935_v7  ;;  %v633_v41 = vmul.f32 %v1956_v23, %v1959_v24 }
  0xe2   : > { %v747_v39 = vadd.f32 %v739_v33, %v717_v32  ;;  %v634_v43 = vmul.f32 %v1956_v23, %v1962_v25  ;;  %v589_v44 = vadd.f32 %v581_v36, %v569_v30  ;;  %v653_v4 = vmul.f32 %v1993_v45, %v2018_v9 }
  0xe3   : > { %v746_v31 = vadd.f32 %v738_v8, %v695_v27  ;;  %v654_v46 = vmul.f32 %v1993_v45, %v2021_v11  ;;  %v668_v47 = vrot.slane %v557_v34, 7  ;;  %v641_v48 = vadd.f32 %v633_v41, %v621_v38 }
  0xe4   : > { %755 = vst [vmem:[%s2046_s23 + $0x8] sm:$0xff] %v747_v39  ;;  %v642_v49 = vadd.f32 %v634_v43, %v622_v40  ;;  %v672_v50 = vrot.slane %v558_v35, 7  ;;  %v570_v51 = vmul.f32 %v1947_v19, %v1935_v7  ;;  %v609_v52 = vadd.f32 %v601_v37, %v589_v44 }
  0xe5   : > { %754 = vst [vmem:[%s2046_s23] sm:$0xff] %v746_v31  ;;  %v582_v53 = vmul.f32 %v1950_v20, %v1962_v25  ;;  %v602_v54 = vmul.f32 %v1952_v21, %v2021_v11  ;;  %v519_v55 = vmul.f32 %v1941_v16, %v1959_v24  ;;  %v661_v56 = vadd.f32 %v653_v4, %v641_v48 }
  0xe6   : > { %v662_v57 = vadd.f32 %v654_v46, %v642_v49  ;;  %v683_v58 = vsel %vm677_vm0, %v672_v50, %v668_v47  ;;  %v679_v7 = vsel %vm677_vm0, %v668_v47, %v672_v50  ;;  %v732_v60 = vadd.f32 %v1991_v42, %v609_v52 }
  0xe7   : > { %v708_v59 = vsel %vm704_vm1, 0.0, %v683_v58  ;;  %v590_v61 = vadd.f32 %v582_v53, %v570_v51  ;;  %v520_v62 = vmul.f32 %v1941_v16, %v1962_v25  ;;  %v687_v63 = vrot.slane %v661_v56, 1 }
  0xe8   : > { %v691_v0 = vrot.slane %v662_v57, 1  ;;  %v531_v5 = vmul.f32 %v1943_v17, %v2018_v9  ;;  %v532_v6 = vmul.f32 %v1943_v17, %v2021_v11  ;;  %v740_v8 = vadd.f32 %v732_v60, %v708_v59  ;;  %v482_v57 = vld [vmem:[%s385_s5] sm:$0xff]  ;;  %v483_v60 = vld [vmem:[%s385_s5 + $0x8] sm:$0xff]  ;;  %s998_s5 = sshll.u32 %s777_s27, 7 }
  0xe9   : > { %v610_v12 = vadd.f32 %v602_v54, %v590_v61  ;;  %v551_v13 = vmul.f32 %v1945_v18, %v2079_v2  ;;  %v552_v14 = vmul.f32 %v1945_v18, %v2082_v3  ;;  %v571_v32 = vmul.f32 %v1947_v19, %v1959_v24  ;;  %s2204_s18 = scalar_lea.hbm %s2415_s3, %s998_s5 }
  0xea   : > { %v696_v15 = vsel %vm694_vm2, %v687_v63, %v691_v0  ;;  %v700_v26 = vsel %vm694_vm2, %v691_v0, %v687_v63  ;;  %v539_v27 = vadd.f32 %v531_v5, %v519_v55  ;;  %v540_v28 = vadd.f32 %v532_v6, %v520_v62 }
  0xeb   : > { %v748_v29 = vadd.f32 %v740_v8, %v696_v15  ;;  %v719_v30 = vsel %vm715_vm3, 0.0, %v700_v26  ;;  %v733_v31 = vadd.f32 %v1991_v42, %v610_v12  ;;  %v583_v35 = vmul.f32 %v1950_v20, %v2018_v9 }
  0xec   : > { %v559_v33 = vadd.f32 %v551_v13, %v539_v27  ;;  %v560_v34 = vadd.f32 %v552_v14, %v540_v28  ;;  %v603_v36 = vmul.f32 %v1952_v21, %v2079_v2  ;;  %v623_v38 = vmul.f32 %v1954_v22, %v1959_v24 }
  0xed   : > { %756 = vst [vmem:[%s2046_s23 + $0x10] sm:$0xff] %v748_v29  ;;  %v741_v37 = vadd.f32 %v733_v31, %v679_v7  ;;  %v624_v39 = vmul.f32 %v1954_v22, %v1962_v25  ;;  %v635_v40 = vmul.f32 %v1956_v23, %v2018_v9  ;;  %v591_v41 = vadd.f32 %v583_v35, %v571_v32 }
  0xee   : > { %v636_v43 = vmul.f32 %v1956_v23, %v2021_v11  ;;  %v655_v44 = vmul.f32 %v1993_v45, %v2079_v2  ;;  %v656_v4 = vmul.f32 %v1993_v45, %v2082_v3  ;;  %v669_v47 = vrot.slane %v559_v33, 7 }
  0xef   : > { %v749_v46 = vadd.f32 %v741_v37, %v719_v30  ;;  %v643_v24 = vadd.f32 %v635_v40, %v623_v38  ;;  %v673_v48 = vrot.slane %v560_v34, 7  ;;  %v611_v49 = vadd.f32 %v603_v36, %v591_v41 }
  0xf0   : > { %v644_v50 = vadd.f32 %v636_v43, %v624_v39  ;;  %v572_v51 = vmul.f32 %v1947_v19, %v1962_v25  ;;  %v584_v52 = vmul.f32 %v1950_v20, %v2021_v11  ;;  %v604_v55 = vmul.f32 %v1952_v21, %v2082_v3 }
  0xf1   : > { %757 = vst [vmem:[%s2046_s23 + $0x18] sm:$0xff] %v749_v46  ;;  %v663_v53 = vadd.f32 %v655_v44, %v643_v24  ;;  %v684_v54 = vsel %vm677_vm0, %v673_v48, %v669_v47  ;;  %v680_v56 = vsel %vm677_vm0, %v669_v47, %v673_v48  ;;  %v734_v7 = vadd.f32 %v1991_v42, %v611_v49 }
  0xf2   : > { %v664_v58 = vadd.f32 %v656_v4, %v644_v50  ;;  %v710_v25 = vsel %vm704_vm1, 0.0, %v684_v54  ;;  %v592_v59 = vadd.f32 %v584_v52, %v572_v51  ;;  %v484_v62 = vstv %s457_s17 }
  0xf3   : > { %v688_v61 = vrot.slane %v663_v53, 1  ;;  %v521_v63 = vmul.f32 %v1941_v16, %v2018_v9  ;;  %v522_v0 = vmul.f32 %v1941_v16, %v2021_v11  ;;  %v742_v6 = vadd.f32 %v734_v7, %v710_v25 }
  0xf4   : > { %v692_v5 = vrot.slane %v664_v58, 1  ;;  %v612_v8 = vadd.f32 %v604_v55, %v592_v59  ;;  %v485_v12 = vmul.f32 %v484_v62, %v482_v57  ;;  %v486_v13 = vmul.f32 %v484_v62, %v483_v60 }
  0xf5   : > { %v533_v14 = vmul.f32 %v1943_v17, %v2079_v2  ;;  %v534_v15 = vmul.f32 %v1943_v17, %v2082_v3  ;;  %v573_v26 = vmul.f32 %v1947_v19, %v2018_v9  ;;  %v585_v35 = vmul.f32 %v1950_v20, %v2079_v2 }
  0xf6   : > { %v697_v27 = vsel %vm694_vm2, %v688_v61, %v692_v5  ;;  %v701_v16 = vsel %vm694_vm2, %v692_v5, %v688_v61  ;;  %v735_v28 = vadd.f32 %v1991_v42, %v612_v8  ;;  %v553_v29 = vmul.f32 %v1945_v18, %v485_v12 }
  0xf7   : > { %v750_v30 = vadd.f32 %v742_v6, %v697_v27  ;;  %v721_v31 = vsel %vm715_vm3, 0.0, %v701_v16  ;;  %v541_v32 = vadd.f32 %v533_v14, %v521_v63  ;;  %v542_v17 = vadd.f32 %v534_v15, %v522_v0 }
  0xf8   : > { %v743_v33 = vadd.f32 %v735_v28, %v680_v56  ;;  %v554_v34 = vmul.f32 %v1945_v18, %v486_v13  ;;  %v605_v36 = vmul.f32 %v1952_v21, %v485_v12  ;;  %v625_v38 = vmul.f32 %v1954_v22, %v2018_v9 }
  0xf9   : > { %758 = vst [vmem:[%s2046_s23 + $0x20] sm:$0xff] %v750_v30  ;;  %v561_v37 = vadd.f32 %v553_v29, %v541_v32  ;;  %v626_v39 = vmul.f32 %v1954_v22, %v2021_v11  ;;  %v637_v40 = vmul.f32 %v1956_v23, %v2079_v2  ;;  %v593_v18 = vadd.f32 %v585_v35, %v573_v26 }
  0xfa   : > { %v751_v41 = vadd.f32 %v743_v33, %v721_v31  ;;  %v562_v43 = vadd.f32 %v554_v34, %v542_v17  ;;  %v638_v44 = vmul.f32 %v1956_v23, %v2082_v3  ;;  %v657_v46 = vmul.f32 %v1993_v45, %v485_v12 }
  0xfb   : > { %v645_v4 = vadd.f32 %v637_v40, %v625_v38  ;;  %v658_v9 = vmul.f32 %v1993_v45, %v486_v13  ;;  %v670_v24 = vrot.slane %v561_v37, 7  ;;  %v613_v22 = vadd.f32 %v605_v36, %v593_v18 }
  0xfc   : > { %759 = vst [vmem:[%s2046_s23 + $0x28] sm:$0xff] %v751_v41  ;;  %v646_v47 = vadd.f32 %v638_v44, %v626_v39  ;;  %v674_v48 = vrot.slane %v562_v43, 7  ;;  %v574_v2 = vmul.f32 %v1947_v19, %v2021_v11  ;;  %v586_v50 = vmul.f32 %v1950_v20, %v2082_v3 }
  0xfd   : > { %v665_v49 = vadd.f32 %v657_v46, %v645_v4  ;;  %v606_v23 = vmul.f32 %v1952_v21, %v486_v13  ;;  %v736_v52 = vadd.f32 %v1991_v42, %v613_v22 }
  0xfe   : > { %v666_v51 = vadd.f32 %v658_v9, %v646_v47  ;;  %v685_v45 = vsel %vm677_vm0, %v674_v48, %v670_v24  ;;  %v594_v11 = vadd.f32 %v586_v50, %v574_v2  ;;  %v681_v3 = vsel %vm677_vm0, %v670_v24, %v674_v48 }
  0xff   : > { %v689_v53 = vrot.slane %v665_v49, 1  ;;  %v712_v19 = vsel %vm704_vm1, 0.0, %v685_v45 }
 0x100   : > { %v693_v54 = vrot.slane %v666_v51, 1  ;;  %v744_v55 = vadd.f32 %v736_v52, %v712_v19  ;;  %v614_v20 = vadd.f32 %v606_v23, %v594_v11 }
 0x102   : > { %v698_v21 = vsel %vm694_vm2, %v689_v53, %v693_v54  ;;  %v702_v56 = vsel %vm694_vm2, %v693_v54, %v689_v53  ;;  %v737_v58 = vadd.f32 %v1991_v42, %v614_v20 }
 0x103   : > { %v752_v57 = vadd.f32 %v744_v55, %v698_v21  ;;  %v723_v25 = vsel %vm715_vm3, 0.0, %v702_v56 }
 0x104   : > { %v745_v7 = vadd.f32 %v737_v58, %v681_v3 }
 0x105   : > { %760 = vst [vmem:[%s2046_s23 + $0x30] sm:$0xff] %v752_v57 }
 0x106   : > { %v753_v1 = vadd.f32 %v745_v7, %v723_v25 }
 0x108   : > { %761 = vst [vmem:[%s2046_s23 + $0x38] sm:$0xff] %v753_v1 }
 0x109   : > { %1319 = shalt.err (!%p1316_p6)
}
 0x10a   : > { %s1320_s14 = scalar_lea.hbm %s2204_s18, 1024  ;;  %s1324_s10 = scalar_lea.hbm %s2415_s3, 16384 }
 0x10b   : > { %p1321_p1 = scmp.ne.s32.totalorder %s2204_s18, %s1320_s14  ;;  %p1325_p11 = scmp.lt.s32.totalorder %s2204_s18, %s2415_s3 }
 0x10c   : > { %p1326_p7 = scmp.lt.s32.totalorder %s1324_s10, %s1320_s14 }
 0x10d   : > { %p1322_p3 = pnand %p1321_p1, %p2416_p5 }
 0x10e   : > { %p1327_p4 = por %p1326_p7, %p1325_p11 }
 0x10f   : > { %p1323_p2 = pneg %p1322_p3 }
 0x111   : > { %p1328_p12 = pnand %p1327_p4, %p1323_p2 }
 0x113   : > { %1331 = shalt.err (!%p1328_p12)
}
 0x114   : > { %s1514_s30 = smov 128   ;;  %s1515_s17 = smov 256  }
 0x115   : > { %s1516_s6 = smov 8  }
 0x116   : > { %1013 = dma.vmem_to_hbm [thread:$0]  (%p2416_p5), %s2198_s4, 1024, %s2204_s18, %s763_s0, %s1514_s30, %s1515_s17, %s1516_s6  }
 0x117 PF: > { %s2417_s7 = sld [smem:[#allocation25_spill]]  ;;  %p1033_p9 = scmp.ge.s32.totalorder %s1502_s11, 2 }
 0x118   : > { %s2418_s21 = sld [smem:[#allocation40_spill]] }
 0x11d   : > { %s795_s22 = sand.u32 1, %s2417_s7  }
 0x11e   : > { %p2419_p0 = scmp.ne.s32.totalorder %s2418_s21, 0  ;;  %s796_s27 = scalar_lea.sflag [#allocation5], %s795_s22 }
 0x120   : > { %p1029_p8 = pnand %p1033_p9, %p2419_p0 }
 0x122   : > { %p1030_p10 = pneg %p1029_p8 }
 0x124   : > { %1425 = dma.done.wait (%p1030_p10), %s796_s27, 1024  }
 0x125   : > { %1427 = vsyncadd (%p1030_p10), %s796_s27, 4294966272  ;;  %s27_s11 = sadd.s32 1, %s1502_s11   ;;  %s2421_s18 = sld [smem:[#allocation18_spill]] }
 0x126   : > { %p2235_p13 = scmp.ge.s32.totalorder %s27_s11, 18   ;;  %s2422_s2 = sld [smem:[#allocation19_spill]] }
 0x127   : > { %s2423_s4 = smov %s1856_s19  ;;  %s2424_s21 = sld [smem:[#allocation21_spill]] }
 0x128   : > { %s2425_s22 = sld [smem:[#allocation22_spill]]  ;;  %s2437_s20 = smov %s2423_s4 }
 0x129   : > { %s2426_s24 = sld [smem:[#allocation23_spill]]  ;;  %s2438_s23 = smov %s2462_s13 }
 0x12a   : > { %s2427_s25 = sld [smem:[#allocation24_spill]]  ;;  %s2439_s27 = smov %s1470_s28 }
 0x12b   : > { %s2428_s26 = sld [smem:[#allocation37_spill]]  ;;  %s2441_s6 = smov %s1494_s9 }
 0x12c   : > { %s2429_s16 = sld [smem:[#allocation26_spill]]  ;;  %s2435_s19 = smov %s2422_s2 }
 0x12d   : > { %s2430_s29 = sld [smem:[#allocation38_spill]] }
 0x12e   : > { %s2431_s30 = sld [smem:[#allocation30_spill]] }
 0x12f   : > { %s2432_s7 = sld [smem:[#allocation31_spill]] }
 0x130   : > { %s2433_s8 = sld [smem:[#allocation32_spill]] }
 0x131   : > { %s2434_s12 = sld [smem:[#allocation33_spill]] }
 0x132   : > { %s2436_s10 = sld [smem:[#allocation34_spill]]  ;;  %s2440_s28 = smov %s2429_s16 }
 0x133   :  { %26 = sbr.rel (!%p2235_p13) target bundleno = 24 (0x18), region = 128 }
 0x137   : > { %s2442_s9 = smov %s2434_s12 }
 0x138   :  { %801 = vsyncpa [#allocation4], 1 }
 0x139   :  { %803 = vsyncpa [#allocation4 + $0x1], 1 }
 0x13a   :  { %804 = vsyncpa [#allocation7], 1 }
 0x13b   :  { %806 = vsyncpa [#allocation7 + $0x1], 1 }
 0x13c   :  { %807 = vsyncpa [#allocation10], 1 }
 0x13d   :  { %809 = vsyncpa [#allocation10 + $0x1], 1 }
 0x13e   :  { %810 = vsyncpa [#allocation5], 1 }
 0x13f   :  { %812 = vsyncpa [#allocation5 + $0x1], 1 }

</bundles_post_ra>
